<compile_context>
chip_gen: v6e
topology: v6e:2x2x1
jax: 0.10.0
libtpu: 0.0.40
codegen_flags: <defaults>
</compile_context>

<pallas_src>
import functools

import jax
import jax.numpy as jnp
from jax.experimental import pallas as pl
from jax.experimental.pallas import tpu as pltpu


def _self_attention_kernel(x_ref, wqkv_ref, wo_ref, bo_ref, out_ref,
                           q_scr, k_scr, v_scr, *, heads, dim_heads, tq):
    """Grid = (batch, num_query_tiles); one (TQ, DIM_OUT) output tile per step."""
    qi = pl.program_id(1)
    H, E = heads, dim_heads
    DH = H * E
    T = x_ref.shape[0]
    DIM_OUT = out_ref.shape[-1]

    # ---- once per batch element: fused QKV projection into VMEM scratch ----
    @pl.when(qi == 0)
    def _():
        x = x_ref[...].astype(jnp.bfloat16)                        # (T, DIM)
        qkv = jnp.dot(x, wqkv_ref[...],                            # (T, 3*DH)
                      preferred_element_type=jnp.float32)

        def to_heads(z):                                           # (T, DH) -> (H, T, E)
            return z.reshape(T, H, E).transpose(1, 0, 2).astype(jnp.bfloat16)

        q_scr[...] = to_heads(qkv[:, :DH])          # scale already folded into wq
        k_scr[...] = to_heads(qkv[:, DH:2 * DH])
        v_scr[...] = to_heads(qkv[:, 2 * DH:])

    # ---- per query tile: heads-batched attention ----------------------------
    q0 = pl.multiple_of(qi * tq, tq)
    q = q_scr[:, pl.ds(q0, tq), :]                                 # (H, TQ, E) bf16
    k = k_scr[...]                                                 # (H, T,  E) bf16
    v = v_scr[...]                                                 # (H, T,  E) bf16

    # QK^T batched over heads; contracts last dims, no explicit transpose.
    dots = jnp.einsum('hqe,hke->hqk', q, k,
                      preferred_element_type=jnp.float32)          # (H, TQ, T) f32

    # Numerically-stable softmax in f32; denominator applied after P@V.
    m = jnp.max(dots, axis=-1, keepdims=True)
    p = jnp.exp(dots - m)
    l = jnp.sum(p, axis=-1, keepdims=True)                         # (H, TQ, 1)

    pv = jnp.einsum('hqk,hke->hqe', p.astype(jnp.bfloat16), v,
                    preferred_element_type=jnp.float32)            # (H, TQ, E) f32
    pv = pv * pl.reciprocal(l, approx=True)                        # deferred normalization

    # Output projection: accumulate each head straight into (TQ, DIM_OUT);
    # wo is pre-shaped (H, E, DIM_OUT) so no head concatenate / merge relayout.
    acc = jnp.zeros((tq, DIM_OUT), jnp.float32)
    for h in range(H):                                             # static unroll, H is small
        acc = acc + jnp.dot(pv[h].astype(jnp.bfloat16), wo_ref[h],
                            preferred_element_type=jnp.float32)

    out_ref[...] = (acc + bo_ref[...]).astype(out_ref.dtype)


def self_attention(x, wq, wk, wv, wo, bo, *, heads, dim_heads, tq=None):
    """Pallas forward for atmorep SelfAttention (default kv=None, i.e. kv = x)."""
    B, T, DIM = x.shape
    DH = heads * dim_heads
    DIM_OUT = wo.shape[-1]
    assert wq.shape == (DIM, DH) and wk.shape == (DIM, DH) and wv.shape == (DIM, DH)
    assert wo.shape == (DH, DIM_OUT)

    # Query-tile size: multiple of 8 that divides T (full T for short sequences).
    if tq is None:
        tq = 128 if (T > 128 and T % 128 == 0) else T
    assert T % tq == 0
    nq = T // tq

    # Fold the 1/sqrt(dim_heads) scale into wq; fuse Q/K/V weights into one
    # (DIM, 3*DH) bf16 operand; reshape wo per-head to (H, E, DIM_OUT).
    scale = float(dim_heads) ** -0.5
    wqkv = jnp.concatenate([wq * scale, wk, wv], axis=-1).astype(jnp.bfloat16)
    wo_h = wo.reshape(heads, dim_heads, DIM_OUT).astype(jnp.bfloat16)
    bo2 = bo.reshape(1, DIM_OUT).astype(jnp.float32)

    kernel = functools.partial(_self_attention_kernel,
                               heads=heads, dim_heads=dim_heads, tq=tq)

    flops = (2 * B * T * DIM * 3 * DH              # fused QKV projection
             + 4 * B * heads * T * T * dim_heads   # QK^T + P@V
             + 2 * B * T * DH * DIM_OUT)           # output projection
    cost = pl.CostEstimate(
        flops=flops,
        transcendentals=B * heads * T * T,
        bytes_accessed=(x.size * x.dtype.itemsize + wqkv.size * 2
                        + wo_h.size * 2 + bo2.size * 4
                        + B * T * DIM_OUT * x.dtype.itemsize))

    # Note: for production model dims keep DIM_OUT a multiple of 128 so output
    # stores are unmasked lane-dense vst (pad wo/bo columns if necessary).
    return pl.pallas_call(
        kernel,
        out_shape=jax.ShapeDtypeStruct((B, T, DIM_OUT), x.dtype),
        grid_spec=pltpu.PrefetchScalarGridSpec(
            num_scalar_prefetch=0,
            grid=(B, nq),
            in_specs=[
                # x: block index ignores qi -> one HBM->VMEM DMA per batch element.
                pl.BlockSpec((pl.Squeezed(), T, DIM), lambda b, qi: (b, 0, 0)),
                pl.BlockSpec((DIM, 3 * DH), lambda b, qi: (0, 0)),                    # wqkv
                pl.BlockSpec((heads, dim_heads, DIM_OUT), lambda b, qi: (0, 0, 0)),   # wo
                pl.BlockSpec((1, DIM_OUT), lambda b, qi: (0, 0)),                     # bo
            ],
            out_specs=pl.BlockSpec((pl.Squeezed(), tq, DIM_OUT),
                                   lambda b, qi: (b, qi, 0)),
            scratch_shapes=[
                pltpu.VMEM((heads, T, dim_heads), jnp.bfloat16),   # Q (pre-scaled)
                pltpu.VMEM((heads, T, dim_heads), jnp.bfloat16),   # K
                pltpu.VMEM((heads, T, dim_heads), jnp.bfloat16),   # V
            ]),
        compiler_params=pltpu.CompilerParams(
            # b is independent work (megacore / v7x 2 TCs); qi stays sequential
            # because the QKV scratch computed at qi==0 is reused across tiles.
            dimension_semantics=("parallel", "arbitrary"),
            vmem_limit_bytes=48 * 1024 * 1024),
        cost_estimate=cost,
    )(x, wqkv, wo_h, bo2)


def self_attention_ref(x, wq, wk, wv, wo, bo, *, heads, dim_heads):
    """Pure-JAX f32 reference mirroring the PyTorch forward exactly."""
    b, t, _ = x.shape
    h, e = heads, dim_heads
    q = x @ wq
    k = x @ wk
    v = x @ wv
    d = q.shape[-1]                      # torch code uses dim_hidden here

    def merge(z):
        return z.reshape(b, -1, h, e).transpose(0, 2, 1, 3).reshape(b * h, -1, e)

    q, k, v = map(merge, (q, k, v))
    dots = jnp.einsum('bie,bje->bij', q, k) * (e ** -0.5)
    dots = jax.nn.softmax(dots, axis=-1)
    out = jnp.einsum('bij,bje->bie', dots, v)
    out = out.reshape(b, h, -1, e).transpose(0, 2, 1, 3).reshape(b, -1, d)
    return out @ wo + bo[0]


if __name__ == "__main__":
    # Small shapes consistent with the module.
    B, T, DIM = 2, 8, 32
    HEADS = 4
    DIM_HEADS = DIM // HEADS            # 8
    DIM_HIDDEN = HEADS * DIM_HEADS      # 32

    key = jax.random.PRNGKey(0)
    kx, kq, kkv, kwo, kbo = jax.random.split(key, 5)

    x = jax.random.normal(kx, (B, T, DIM), dtype=jnp.float32)

    # Deterministic parameter init (Linear weights stored transposed).
    wq = jax.random.normal(kq, (DIM, DIM_HIDDEN), dtype=jnp.float32) * 0.05
    wkv = jax.random.normal(kkv, (DIM, 2 * DIM_HIDDEN), dtype=jnp.float32) * 0.05
    wk, wv = wkv[:, :DIM_HIDDEN], wkv[:, DIM_HIDDEN:]   # torch .chunk(2, dim=-1)
    wo = jax.random.normal(kwo, (DIM_HIDDEN, DIM), dtype=jnp.float32) * 0.05
    bo = jax.random.normal(kbo, (1, DIM), dtype=jnp.float32) * 0.05

    out = self_attention(x, wq, wk, wv, wo, bo,
                         heads=HEADS, dim_heads=DIM_HEADS)
    out = jax.block_until_ready(out)

    ref = self_attention_ref(x, wq, wk, wv, wo, bo,
                             heads=HEADS, dim_heads=DIM_HEADS)
    assert out.shape == (B, T, DIM)
    # Tolerance relaxed vs the f32 reference: kernel uses bf16 MXU operands and
    # an approx reciprocal for the deferred softmax normalization.
    assert jnp.allclose(out, ref, atol=2e-2, rtol=2e-2), "mismatch vs reference"

    print("KERNEL_OK")
</pallas_src>

<mosaic_0001>
module attributes {stable_mosaic.version = 11 : i64} {
  func.func @_self_attention_kernel(%arg0: i32, %arg1: i32, %arg2: memref<1x8x32xf32, #tpu.memory_space<vmem>>, %arg3: memref<32x96xbf16, #tpu.memory_space<vmem>>, %arg4: memref<4x8x32xbf16, #tpu.memory_space<vmem>>, %arg5: memref<1x32xf32, #tpu.memory_space<vmem>>, %arg6: memref<1x8x32xf32, #tpu.memory_space<vmem>>, %arg7: memref<4x8x8xbf16, #tpu.memory_space<vmem>>, %arg8: memref<4x8x8xbf16, #tpu.memory_space<vmem>>, %arg9: memref<4x8x8xbf16, #tpu.memory_space<vmem>>) attributes {dimension_semantics = [#tpu.dimension_semantics<parallel>, #tpu.dimension_semantics<arbitrary>], iteration_bounds = array<i64: 2, 1>, scalar_prefetch = 0 : i64, scratch_operands = 3 : i64, tpu.core_type = #tpu.core_type<tc>, window_params = [{transform_indices = @transform_0, window_bounds = array<i64: 1, 8, 32>}, {pipeline_mode = #tpu.pipeline_mode<synchronous>, transform_indices = @transform_1, window_bounds = array<i64: 32, 96>}, {pipeline_mode = #tpu.pipeline_mode<synchronous>, transform_indices = @transform_2, window_bounds = array<i64: 4, 8, 32>}, {pipeline_mode = #tpu.pipeline_mode<synchronous>, transform_indices = @transform_3, window_bounds = array<i64: 1, 32>}, {transform_indices = @transform_4, window_bounds = array<i64: 1, 8, 32>}]} {
    %c0_i32 = arith.constant 0 : i32
    %0 = arith.cmpi eq, %arg1, %c0_i32 : i32
    %1 = arith.extui %0 : i1 to i32
    %c0_i32_0 = arith.constant 0 : i32
    %2 = arith.cmpi ne, %1, %c0_i32_0 : i32
    scf.if %2 {
      %c0_30 = arith.constant 0 : index
      %c0_31 = arith.constant 0 : index
      %c0_32 = arith.constant 0 : index
      %57 = vector.load %arg2[%c0_30, %c0_31, %c0_32] : memref<1x8x32xf32, #tpu.memory_space<vmem>>, vector<1x8x32xf32>
      %58 = vector.shape_cast %57 : vector<1x8x32xf32> to vector<8x32xf32>
      %59 = arith.truncf %58 : vector<8x32xf32> to vector<8x32xbf16>
      %c0_33 = arith.constant 0 : index
      %c0_34 = arith.constant 0 : index
      %60 = vector.load %arg3[%c0_33, %c0_34] : memref<32x96xbf16, #tpu.memory_space<vmem>>, vector<32x96xbf16>
      %cst_35 = arith.constant dense<0.000000e+00> : vector<8x96xf32>
      %61 = tpu.matmul %59, %60, %cst_35 {dimension_numbers = #tpu.dot_dimension_numbers<[1], [0], [0], [1], [0, 0, 1, 1], [], []>} : vector<8x32xbf16>, vector<32x96xbf16>, vector<8x96xf32> -> vector<8x96xf32>
      %62 = vector.extract_strided_slice %61 {offsets = [0, 0], sizes = [8, 32], strides = [1, 1]} : vector<8x96xf32> to vector<8x32xf32>
      %63 = vector.shape_cast %62 : vector<8x32xf32> to vector<8x4x8xf32>
      %64 = tpu.transpose %63, [1, 0, 2] : vector<8x4x8xf32> -> vector<4x8x8xf32>
      %65 = arith.truncf %64 : vector<4x8x8xf32> to vector<4x8x8xbf16>
      %c0_36 = arith.constant 0 : index
      %c0_37 = arith.constant 0 : index
      %c0_38 = arith.constant 0 : index
      %66 = vector.load %arg7[%c0_36, %c0_37, %c0_38] : memref<4x8x8xbf16, #tpu.memory_space<vmem>>, vector<4x8x8xbf16>
      tpu.vector_store %arg7[%c0_36, %c0_37, %c0_38], %65 {strides = array<i32>} : memref<4x8x8xbf16, #tpu.memory_space<vmem>>, vector<4x8x8xbf16>,
      %67 = vector.extract_strided_slice %61 {offsets = [0, 32], sizes = [8, 32], strides = [1, 1]} : vector<8x96xf32> to vector<8x32xf32>
      %68 = vector.shape_cast %67 : vector<8x32xf32> to vector<8x4x8xf32>
      %69 = tpu.transpose %68, [1, 0, 2] : vector<8x4x8xf32> -> vector<4x8x8xf32>
      %70 = arith.truncf %69 : vector<4x8x8xf32> to vector<4x8x8xbf16>
      %c0_39 = arith.constant 0 : index
      %c0_40 = arith.constant 0 : index
      %c0_41 = arith.constant 0 : index
      %71 = vector.load %arg8[%c0_39, %c0_40, %c0_41] : memref<4x8x8xbf16, #tpu.memory_space<vmem>>, vector<4x8x8xbf16>
      tpu.vector_store %arg8[%c0_39, %c0_40, %c0_41], %70 {strides = array<i32>} : memref<4x8x8xbf16, #tpu.memory_space<vmem>>, vector<4x8x8xbf16>,
      %72 = vector.extract_strided_slice %61 {offsets = [0, 64], sizes = [8, 32], strides = [1, 1]} : vector<8x96xf32> to vector<8x32xf32>
      %73 = vector.shape_cast %72 : vector<8x32xf32> to vector<8x4x8xf32>
      %74 = tpu.transpose %73, [1, 0, 2] : vector<8x4x8xf32> -> vector<4x8x8xf32>
      %75 = arith.truncf %74 : vector<4x8x8xf32> to vector<4x8x8xbf16>
      %c0_42 = arith.constant 0 : index
      %c0_43 = arith.constant 0 : index
      %c0_44 = arith.constant 0 : index
      %76 = vector.load %arg9[%c0_42, %c0_43, %c0_44] : memref<4x8x8xbf16, #tpu.memory_space<vmem>>, vector<4x8x8xbf16>
      tpu.vector_store %arg9[%c0_42, %c0_43, %c0_44], %75 {strides = array<i32>} : memref<4x8x8xbf16, #tpu.memory_space<vmem>>, vector<4x8x8xbf16>,
    } else {
    }
    %c8_i32 = arith.constant 8 : i32
    %3 = arith.muli %arg1, %c8_i32 : i32
    %4 = tpu.assume_multiple %3, 8 : i32
    %c0 = arith.constant 0 : index
    %5 = arith.index_cast %4 : i32 to index
    %c0_1 = arith.constant 0 : index
    %6 = vector.load %arg7[%c0, %5, %c0_1] : memref<4x8x8xbf16, #tpu.memory_space<vmem>>, vector<4x8x8xbf16>
    %c0_2 = arith.constant 0 : index
    %c0_3 = arith.constant 0 : index
    %c0_4 = arith.constant 0 : index
    %7 = vector.load %arg8[%c0_2, %c0_3, %c0_4] : memref<4x8x8xbf16, #tpu.memory_space<vmem>>, vector<4x8x8xbf16>
    %c0_5 = arith.constant 0 : index
    %c0_6 = arith.constant 0 : index
    %c0_7 = arith.constant 0 : index
    %8 = vector.load %arg9[%c0_5, %c0_6, %c0_7] : memref<4x8x8xbf16, #tpu.memory_space<vmem>>, vector<4x8x8xbf16>
    "tpu.trace_start"() <{level = 10 : i32, message = "hqe,hke->hqk"}> : () -> ()
    %cst = arith.constant dense<0.000000e+00> : vector<4x8x8xf32>
    %9 = tpu.matmul %6, %7, %cst {dimension_numbers = #tpu.dot_dimension_numbers<[2], [2], [1], [1], [0, 0, 0, 1, 1, 1], [0], [0]>} : vector<4x8x8xbf16>, vector<4x8x8xbf16>, vector<4x8x8xf32> -> vector<4x8x8xf32>
    "tpu.trace_stop"() : () -> ()
    %cst_8 = arith.constant dense<0xFF800000> : vector<4x8xf32>
    %10 = vector.multi_reduction <maximumf>, %9, %cst_8 [2] : vector<4x8x8xf32> to vector<4x8xf32>
    %11 = vector.shape_cast %10 : vector<4x8xf32> to vector<4x8x1xf32>
    %12 = vector.broadcast %11 : vector<4x8x1xf32> to vector<4x8x8xf32>
    %13 = arith.subf %9, %12 : vector<4x8x8xf32>
    %14 = math.exp %13 : vector<4x8x8xf32>
    %cst_9 = arith.constant dense<0.000000e+00> : vector<4x8xf32>
    %15 = vector.multi_reduction <add>, %14, %cst_9 [2] : vector<4x8x8xf32> to vector<4x8xf32>
    %16 = vector.shape_cast %15 : vector<4x8xf32> to vector<4x8x1xf32>
    %17 = arith.truncf %14 : vector<4x8x8xf32> to vector<4x8x8xbf16>
    "tpu.trace_start"() <{level = 10 : i32, message = "hqk,hke->hqe"}> : () -> ()
    %cst_10 = arith.constant dense<0.000000e+00> : vector<4x8x8xf32>
    %18 = tpu.matmul %17, %8, %cst_10 {dimension_numbers = #tpu.dot_dimension_numbers<[2], [1], [1], [2], [0, 0, 0, 1, 1, 2], [0], [0]>} : vector<4x8x8xbf16>, vector<4x8x8xbf16>, vector<4x8x8xf32> -> vector<4x8x8xf32>
    "tpu.trace_stop"() : () -> ()
    %19 = tpu.reciprocal %16 {approx = true} : vector<4x8x1xf32> -> vector<4x8x1xf32>
    %20 = vector.broadcast %19 : vector<4x8x1xf32> to vector<4x8x8xf32>
    %21 = arith.mulf %18, %20 : vector<4x8x8xf32>
    %cst_11 = arith.constant 0.000000e+00 : f32
    %22 = vector.broadcast %cst_11 : f32 to vector<8x32xf32>
    %23 = vector.extract_strided_slice %21 {offsets = [0, 0, 0], sizes = [1, 8, 8], strides = [1, 1, 1]} : vector<4x8x8xf32> to vector<1x8x8xf32>
    %24 = vector.shape_cast %23 : vector<1x8x8xf32> to vector<8x8xf32>
    %25 = arith.truncf %24 : vector<8x8xf32> to vector<8x8xbf16>
    %c0_12 = arith.constant 0 : index
    %c0_13 = arith.constant 0 : index
    %c0_14 = arith.constant 0 : index
    %26 = vector.load %arg4[%c0_12, %c0_13, %c0_14] : memref<4x8x32xbf16, #tpu.memory_space<vmem>>, vector<1x8x32xbf16>
    %27 = vector.shape_cast %26 : vector<1x8x32xbf16> to vector<8x32xbf16>
    %cst_15 = arith.constant dense<0.000000e+00> : vector<8x32xf32>
    %28 = tpu.matmul %25, %27, %cst_15 {dimension_numbers = #tpu.dot_dimension_numbers<[1], [0], [0], [1], [0, 0, 1, 1], [], []>} : vector<8x8xbf16>, vector<8x32xbf16>, vector<8x32xf32> -> vector<8x32xf32>
    %29 = arith.addf %22, %28 : vector<8x32xf32>
    %30 = vector.extract_strided_slice %21 {offsets = [1, 0, 0], sizes = [1, 8, 8], strides = [1, 1, 1]} : vector<4x8x8xf32> to vector<1x8x8xf32>
    %31 = vector.shape_cast %30 : vector<1x8x8xf32> to vector<8x8xf32>
    %32 = arith.truncf %31 : vector<8x8xf32> to vector<8x8xbf16>
    %c1 = arith.constant 1 : index
    %c0_16 = arith.constant 0 : index
    %c0_17 = arith.constant 0 : index
    %33 = vector.load %arg4[%c1, %c0_16, %c0_17] : memref<4x8x32xbf16, #tpu.memory_space<vmem>>, vector<1x8x32xbf16>
    %34 = vector.shape_cast %33 : vector<1x8x32xbf16> to vector<8x32xbf16>
    %cst_18 = arith.constant dense<0.000000e+00> : vector<8x32xf32>
    %35 = tpu.matmul %32, %34, %cst_18 {dimension_numbers = #tpu.dot_dimension_numbers<[1], [0], [0], [1], [0, 0, 1, 1], [], []>} : vector<8x8xbf16>, vector<8x32xbf16>, vector<8x32xf32> -> vector<8x32xf32>
    %36 = arith.addf %29, %35 : vector<8x32xf32>
    %37 = vector.extract_strided_slice %21 {offsets = [2, 0, 0], sizes = [1, 8, 8], strides = [1, 1, 1]} : vector<4x8x8xf32> to vector<1x8x8xf32>
    %38 = vector.shape_cast %37 : vector<1x8x8xf32> to vector<8x8xf32>
    %39 = arith.truncf %38 : vector<8x8xf32> to vector<8x8xbf16>
    %c2 = arith.constant 2 : index
    %c0_19 = arith.constant 0 : index
    %c0_20 = arith.constant 0 : index
    %40 = vector.load %arg4[%c2, %c0_19, %c0_20] : memref<4x8x32xbf16, #tpu.memory_space<vmem>>, vector<1x8x32xbf16>
    %41 = vector.shape_cast %40 : vector<1x8x32xbf16> to vector<8x32xbf16>
    %cst_21 = arith.constant dense<0.000000e+00> : vector<8x32xf32>
    %42 = tpu.matmul %39, %41, %cst_21 {dimension_numbers = #tpu.dot_dimension_numbers<[1], [0], [0], [1], [0, 0, 1, 1], [], []>} : vector<8x8xbf16>, vector<8x32xbf16>, vector<8x32xf32> -> vector<8x32xf32>
    %43 = arith.addf %36, %42 : vector<8x32xf32>
    %44 = vector.extract_strided_slice %21 {offsets = [3, 0, 0], sizes = [1, 8, 8], strides = [1, 1, 1]} : vector<4x8x8xf32> to vector<1x8x8xf32>
    %45 = vector.shape_cast %44 : vector<1x8x8xf32> to vector<8x8xf32>
    %46 = arith.truncf %45 : vector<8x8xf32> to vector<8x8xbf16>
    %c3 = arith.constant 3 : index
    %c0_22 = arith.constant 0 : index
    %c0_23 = arith.constant 0 : index
    %47 = vector.load %arg4[%c3, %c0_22, %c0_23] : memref<4x8x32xbf16, #tpu.memory_space<vmem>>, vector<1x8x32xbf16>
    %48 = vector.shape_cast %47 : vector<1x8x32xbf16> to vector<8x32xbf16>
    %cst_24 = arith.constant dense<0.000000e+00> : vector<8x32xf32>
    %49 = tpu.matmul %46, %48, %cst_24 {dimension_numbers = #tpu.dot_dimension_numbers<[1], [0], [0], [1], [0, 0, 1, 1], [], []>} : vector<8x8xbf16>, vector<8x32xbf16>, vector<8x32xf32> -> vector<8x32xf32>
    %50 = arith.addf %43, %49 : vector<8x32xf32>
    %c0_25 = arith.constant 0 : index
    %c0_26 = arith.constant 0 : index
    %51 = vector.load %arg5[%c0_25, %c0_26] : memref<1x32xf32, #tpu.memory_space<vmem>>, vector<1x32xf32>
    %52 = vector.broadcast %51 : vector<1x32xf32> to vector<8x32xf32>
    %53 = arith.addf %50, %52 : vector<8x32xf32>
    %c0_27 = arith.constant 0 : index
    %c0_28 = arith.constant 0 : index
    %c0_29 = arith.constant 0 : index
    %54 = vector.load %arg6[%c0_27, %c0_28, %c0_29] : memref<1x8x32xf32, #tpu.memory_space<vmem>>, vector<1x8x32xf32>
    %55 = vector.shape_cast %54 : vector<1x8x32xf32> to vector<8x32xf32>
    %56 = vector.shape_cast %53 : vector<8x32xf32> to vector<1x8x32xf32>
    tpu.vector_store %arg6[%c0_27, %c0_28, %c0_29], %56 {strides = array<i32>} : memref<1x8x32xf32, #tpu.memory_space<vmem>>, vector<1x8x32xf32>,
    return
  }
  func.func @transform_0(%arg0: i32, %arg1: i32) -> (i32, i32, i32) {
    %c0_i32 = arith.constant 0 : i32
    %c0_i32_0 = arith.constant 0 : i32
    %c0_i32_1 = arith.constant 0 : i32
    return %arg0, %c0_i32, %c0_i32_0 : i32, i32, i32
  }
  func.func @transform_1(%arg0: i32, %arg1: i32) -> (i32, i32) {
    %c0_i32 = arith.constant 0 : i32
    %c0_i32_0 = arith.constant 0 : i32
    %c0_i32_1 = arith.constant 0 : i32
    return %c0_i32, %c0_i32_0 : i32, i32
  }
  func.func @transform_2(%arg0: i32, %arg1: i32) -> (i32, i32, i32) {
    %c0_i32 = arith.constant 0 : i32
    %c0_i32_0 = arith.constant 0 : i32
    %c0_i32_1 = arith.constant 0 : i32
    %c0_i32_2 = arith.constant 0 : i32
    return %c0_i32, %c0_i32_0, %c0_i32_1 : i32, i32, i32
  }
  func.func @transform_3(%arg0: i32, %arg1: i32) -> (i32, i32) {
    %c0_i32 = arith.constant 0 : i32
    %c0_i32_0 = arith.constant 0 : i32
    %c0_i32_1 = arith.constant 0 : i32
    return %c0_i32, %c0_i32_0 : i32, i32
  }
  func.func @transform_4(%arg0: i32, %arg1: i32) -> (i32, i32, i32) {
    %c0_i32 = arith.constant 0 : i32
    %c0_i32_0 = arith.constant 0 : i32
    return %arg0, %arg1, %c0_i32 : i32, i32, i32
  }
}

</mosaic_0001>

<bundles_post_ra>
// kernel: tpu_custom_call.1
= control target key start
LH: loop header
LB: loop body
LE: loop exit
PB: predicated region body
PF: predicated region fallthrough
CT: control target
= control target key end

     0   :  { %9 = vsyncpa [#allocation6], 0  ;;  %s2342_s0 = inlined_call_operand.hbm [shape: f32[2,8,32], index: 0, kind: input, shape index: {}]   ;;  %s2343_s1 = inlined_call_operand.hbm [shape: bf16[32,96], index: 1, kind: input, shape index: {}]   ;;  %s2344_s2 = inlined_call_operand.hbm [shape: bf16[4,8,32], index: 2, kind: input, shape index: {}]   ;;  %s2345_s3 = inlined_call_operand.vmem [shape: f32[1,32], index: 3, kind: input, shape index: {}]   ;;  %s2346_s4 = inlined_call_operand.hbm [shape: f32[2,8,32], index: 4, kind: output, shape index: {}]  }
   0x1   :  { %11 = vsyncpa [#allocation6 + $0x1], 0 }
   0x2   :  { %12 = vsyncpa [#allocation9], 0 }
   0x3   :  { %13 = vsyncpa [#allocation7], 0 }
   0x4   :  { %15 = vsyncpa [#allocation7 + $0x1], 0  ;;  %s2011_s15 = smov 0   ;;  %s2013_s16 = smov 0  }
   0x5   :  { %s2015_s17 = smov 0   ;;  %s2017_s18 = smov 0  }
   0x6   :  { %s2019_s19 = smov 0   ;;  %s2021_s20 = smov 0  }
   0x7 LB: > { %s1547_s21 = sadd.s32 4294967295, %s1969_s20   ;;  %s1548_s22 = sadd.s32 4294967294, %s1969_s20   ;;  %s1969_s20 = sphi %s2021_s20, %s21_s20   ;;  %s1965_s19 = sphi %s2019_s19, %s2366_s19   ;;  %s1961_s18 = sphi %s2017_s18, %s2365_s18   ;;  %s1957_s17 = sphi %s2015_s17, %s2364_s17   ;;  %s1953_s16 = sphi %s2013_s16, %s2363_s16   ;;  %s1949_s15 = sphi %s2011_s15, %s2362_s15  }
   0x8   : > { %p53_p0 = scmp.ne.s32.totalorder %s1953_s16, %s1949_s15  ;;  %p2045_p1 = scmp.eq.s32.totalorder %s1547_s21, 0 }
   0x9   : > { %p2049_p2 = scmp.eq.s32.totalorder %s1547_s21, 1  ;;  %p148_p3 = scmp.eq.s32.totalorder %s1548_s22, 1 }
   0xa   : > { %s2350_s23 = scalar_select %p2045_p1, 1, 0 }
   0xb   : > { %p2055_p4 = por %p2045_p1, %p53_p0  ;;  %p1549_p5 = scmp.ge.s32.totalorder %s1969_s20, 1 }
   0xc   : > { %p2060_p6 = por %p148_p3, %p53_p0  ;;  %p155_p7 = scmp.lt.s32.totalorder %s1969_s20, 3 }
   0xd   : > { %s2352_s25 = scalar_select %p2055_p4, 1, 0 }
   0xe   : > { %s2353_s26 = scalar_select %p2060_p6, 1, 0 }
   0xf   : > { %p2065_p8 = pnand %p1549_p5, %p155_p7  ;;  %s1971_s28 = smov [#allocation8]  }
  0x10   : > { %s167_s29 = sshll.u32 %s1971_s28, 4  ;;  %s1972_s5 = smov [#allocation10]   ;;  %s168_s29 = int_to_ptr.vmem [resolvable:$true] %s167_s29 }
  0x11   : > { %p1705_p9 = pneg %p2065_p8  ;;  %s180_s6 = sshll.u32 %s1972_s5, 4  ;;  %s181_s6 = int_to_ptr.vmem [resolvable:$true] %s180_s6 }
  0x12   : > { %s1816_s7 = scalar_lea.vmem %s168_s29, 256  ;;  %p1824_p5 = scmp.lt.s32.totalorder %s168_s29, %s168_s29 }
  0x13   : > { %p2074_p11 = pnand %p1705_p9, %p2045_p1  ;;  %p1817_p13 = scmp.ne.s32.totalorder %s168_s29, %s1816_s7 }
  0x14   : > { %p1825_p7 = scmp.lt.s32.totalorder %s1816_s7, %s1816_s7 }
  0x15   : > { %p1807_p12 = pneg %p2074_p11 }
  0x16   : > { %p1826_p10 = por %p1825_p7, %p1824_p5 }
  0x17   : > { %p1819_p0 = pnand %p1817_p13, %p1807_p12 }
  0x19   : > { %p1820_p3 = pneg %p1819_p0 }
  0x1b   : > { %p1827_p9 = pnand %p1826_p10, %p1820_p3 }
  0x1d   : > { %1830 = shalt.err (!%p1827_p9)
}
  0x1e   : > { %s1973_s8 = smov 64   ;;  %s1974_s9 = smov 4  }
  0x1f   : > { %1708 = dma.hbm_to_vmem [thread:$0]  (!%p2074_p11), %s2343_s1, 256, %s168_s29, [#allocation9], %s1973_s8, %s1973_s8, %s1974_s9  }
  0x20   : > { %s1842_s12 = scalar_lea.vmem %s181_s6, 256  ;;  %p1850_p1 = scmp.lt.s32.totalorder %s181_s6, %s181_s6 }
  0x21   : > { %p1843_p6 = scmp.ne.s32.totalorder %s181_s6, %s1842_s12  ;;  %p1851_p4 = scmp.lt.s32.totalorder %s1842_s12, %s1842_s12 }
  0x23   : > { %p1845_p13 = pnand %p1843_p6, %p1807_p12  ;;  %p1852_p5 = por %p1851_p4, %p1850_p1 }
  0x25   : > { %p1846_p0 = pneg %p1845_p13 }
  0x27   : > { %p1853_p10 = pnand %p1852_p5, %p1846_p0 }
  0x29   : > { %1856 = shalt.err (!%p1853_p10)
}
  0x2a   : > { %1711 = dma.hbm_to_vmem [thread:$0]  (!%p2074_p11), %s2344_s2, 256, %s181_s6, [#allocation9], %s1973_s8, %s1973_s8, %s1974_s9  }
  0x2b   : > { %s33_s21 = sadd.s32 1, %s1965_s19  ;;  %s40_s22 = sadd.s32 1, %s1957_s17 }
  0x2c   : > { %p35_p1 = scmp.ge.s32.totalorder %s33_s21, 2  ;;  %p47_p4 = scmp.ne.s32.totalorder %s1957_s17, %s1953_s16 }
  0x2d   : > { %p48_p6 = scmp.eq.s32.totalorder %s1969_s20, 0  ;;  %p1722_p12 = scmp.lt.s32.totalorder %s1969_s20, 2 }
  0x2e   : > { %s2368_s21 = smov (%p35_p1, %s33_s21), 0  ;;  %p2106_p7 = por %p2049_p2, %p47_p4 }
  0x2f   : > { %p49_p3 = por %p48_p6, %p47_p4  ;;  %s37_s29 = ssub.s32 %s1965_s19, %s2368_s21 }
  0x30   : > { %s197_s30 = sand.u32 1, %s1957_s17   ;;  %p38_p9 = scmp.eq.s32.totalorder %s37_s29, 0 }
  0x31   : > { %s1553_s5 = sshll.u32 %s197_s30, 3  ;;  %s1554_s6 = sshll.u32 %s1965_s19, 7 }
  0x32   : > { %s2115_s7 = scalar_select %p38_p9, %s1957_s17, %s40_s22  }
  0x33   : > { %s206_s10 = scalar_lea.hbm %s2342_s0, %s1554_s6  ;;  %s201_s11 = scalar_lea.vmem [#allocation5], %s1553_s5 }
  0x34   : > { %s208_s12 = sshll.u32 %s201_s11, 4  ;;  %p2122_p11 = pnand %p1722_p12, %p49_p3  ;;  %s209_s12 = int_to_ptr.vmem [resolvable:$true] %s208_s12 }
  0x35   : > { %s198_s13 = scalar_lea.sflag [#allocation6], %s197_s30  ;;  %s1870_s14 = scalar_lea.vmem %s209_s12, 128 }
  0x36   : > { %p1859_p2 = pneg %p2122_p11  ;;  %p1871_p13 = scmp.ne.s32.totalorder %s209_s12, %s1870_s14 }
  0x37   : > { %s1975_s22 = smov [#allocation5]  }
  0x38   : > { %p1873_p0 = pnand %p1871_p13, %p1859_p2  ;;  %s1875_s29 = sshll.u32 %s1975_s22, 4  ;;  %s1876_s29 = int_to_ptr.vmem [resolvable:$false] %s1875_s29 }
  0x39   : > { %s1877_s6 = scalar_lea.vmem %s1876_s29, 256  ;;  %p1878_p10 = scmp.lt.s32.totalorder %s209_s12, %s1876_s29 }
  0x3a   : > { %p1874_p5 = pneg %p1873_p0  ;;  %p1879_p1 = scmp.lt.s32.totalorder %s1877_s6, %s1870_s14 }
  0x3c   : > { %p1880_p4 = por %p1879_p1, %p1878_p10 }
  0x3e   : > { %p1881_p6 = pnand %p1880_p4, %p1874_p5 }
  0x40   : > { %1884 = shalt.err (!%p1881_p6)
}
  0x41   : > { %1715 = dma.hbm_to_vmem [thread:$0]  (!%p2122_p11), %s206_s10, 128, %s209_s12, %s198_s13  }
  0x42   : > { %217 = sbr.rel (%p2065_p8) target bundleno = 1318 (0x526), region = 36  ;;  %s2133_s30 = sand.u32 (!%p2065_p8), 1, %s1953_s16  }
  0x43   : > { %s1556_s5 = sshll.u32 (!%p2065_p8), %s2133_s30, 3  ;;  %s220_s8 = scalar_lea.sflag (!%p2065_p8), [#allocation6], %s2133_s30 }
  0x44   : > { %s223_s9 = scalar_lea.vmem (!%p2065_p8), [#allocation5], %s1556_s5  ;;  %p2358_p12 = scmp.ne.s32.totalorder (!%p2065_p8), %s2352_s25, 0 }
  0x47   : > { %1936 = dma.done.wait (%p2358_p12), %s220_s8, 128  }
  0x48   : > { %1938 = vsyncadd (%p2358_p12), %s220_s8, 4294967168  ;;  %p2359_p3 = scmp.ne.s32.totalorder %s2350_s23, 0 }
  0x4a   : > { %1940 = dma.done.wait (%p2359_p3), [#allocation9], 512  }
  0x4b   : > { %1942 = vsyncadd (%p2359_p3), [#allocation9], 4294966784  ;;  %v1976_v0 = vmov 0.0   ;;  %vm1977_vm0 = vmmov 0   ;;  %v1787_v1 = vld [vmem:[#allocation8 + $0x8] sm:$0xff]   ;;  %v1788_v2 = vld [vmem:[#allocation8] sm:$0xff]   ;;  %v338_v11 = vlaneseq }
  0x4c   : > { %1613 = vmatprep.subr.bf16.mxu0 %v1976_v0  ;;  %1617 = vmatprep.mubr.msk.bf16.mxu0 %vm1977_vm0, %v1976_v0  ;;  %v261_v3 = vld [vmem:[%s223_s9] sm:$0xff]  ;;  %vm279_vm1 = vcmask 261120   ;;  %s1978_s23 = smov 104   ;;  %s1979_s25 = smov 120   ;;  %v1982_v9 = vmov 1983009808  }
  0x4d   : > { %1621 = vmatprep.subr.bf16.mxu1 %v1976_v0  ;;  %1623 = vmatprep.mubr.msk.bf16.mxu1 %vm1977_vm0, %v1976_v0  ;;  %v262_v4 = vpack.c.bf16 %v261_v3, %v261_v3  ;;  %s1980_s27 = smov 96   ;;  %s1981_s10 = smov 112   ;;  %v336_v10 = vunpack.c.l.s4 %v1982_v9  ;;  %v1983_v12 = vmov 1934713408   ;;  %v339_v15 = vshrl.u32 %v338_v11, 7 }
  0x4e   : > { %1614 = vmatpush3.bf16.msra.mxu0 %v1787_v1  ;;  %v368_v13 = vunpack.c.l.s4 %v1983_v12  ;;  %s1984_s11 = smov 64   ;;  %vm473_vm2 = vcmask 60416   ;;  %vm807_vm3 = vcmask 64512   ;;  %vm1035_vm4 = vcmask 1043456   ;;  %s1583_s13 = sshll.u32 %s1961_s18, 7 }
  0x4f   : > { %1615 = vmatprep.subr.bf16.mxu0 %v1976_v0  ;;  %v337_v14 = vunpack.c.0.s8 %v336_v10  ;;  %s255_s14 = scalar_lea.vmem [#allocation11], %s1556_s5  ;;  %s2293_s8 = scalar_lea.hbm %s2346_s4, %s1583_s13 }
  0x50   : > { %v369_v18 = vunpack.c.0.s8 %v368_v13  ;;  %s1447_s22 = sshll.u32 %s255_s14, 4  ;;  %s1433_s18 = scalar_lea.sflag [#allocation7], %s2133_s30  ;;  %s2295_s22 = int_to_ptr.vmem [resolvable:$true] %s1447_s22 }
  0x51   : > { %v2158_v19 = vsub.s32 %v337_v14, %v339_v15  ;;  %s1885_s5 = scalar_lea.vmem %s2295_s22, 128  ;;  %s1985_s9 = smov [#allocation11]  }
  0x52   : > { %1616 = vmatpush3.bf16.msra.mxu0 %v1788_v2  ;;  %v2160_v25 = vsub.s32 %v369_v18, %v339_v15  ;;  %p1886_p8 = scmp.ne.s32.totalorder %s2295_s22, %s1885_s5 }
  0x53   : > { %1627 = vmatprep.subr.bf16.mxu0 %v1976_v0 }
  0x54   : > { %p1887_p9 = pnand %p1886_p8, %p2106_p7 }
  0x55   : > { %1618 = vmatmul.mubr.msk.bf16.vlgmr.msra.gmra.mxu0 %vm279_vm1, %v262_v4 }
  0x56   : > { %1629 = vmatprep.mubr.msk.bf16.mxu0 %vm1977_vm0, %v1976_v0  ;;  %p1888_p11 = pneg %p1887_p9 }
 0x115   : > { %v317_v5 = vpop.f32.mrf.mxu0 }
 0x116   : > { %330 = vrot.lane.b32.xlu1 %v317_v5, %s1978_s23  ;;  %324 = vrot.lane.b32.xlu0 %v317_v5, %s1979_s25  ;;  %s1889_s23 = sshll.u32 %s1985_s9, 4  ;;  %s1890_s23 = int_to_ptr.vmem [resolvable:$false] %s1889_s23 }
 0x117   : > { %v1619_v6 = vpop.f32.mrf.mxu0  ;;  %s1891_s25 = scalar_lea.vmem %s1890_s23, 256  ;;  %p1892_p2 = scmp.lt.s32.totalorder %s2295_s22, %s1890_s23 }
 0x118   : > { %p1893_p13 = scmp.lt.s32.totalorder %s1891_s25, %s1885_s5 }
 0x119   : > { %v320_v7 = vpop.f32.mrf.mxu0 }
 0x11a   : > { %478 = vrot.lane.b32.xlu1 %v317_v5, %s1980_s27  ;;  %327 = vrot.lane.b32.xlu0 %v317_v5, %s1981_s10  ;;  %p1894_p0 = por %p1893_p13, %p1892_p2 }
 0x11b   : > { %v1620_v8 = vpop.f32.mrf.mxu0 }
 0x11c   : > { %p1895_p5 = pnand %p1894_p0, %p1888_p11 }
 0x188   : > { %v331_v16 = vpop.permute.xlu1 %330  ;;  %v325_v17 = vpop.permute.xlu0 %324 }
 0x189   : > { %480 = vrot.lane.b32.xlu0 %v325_v17, %s1980_s27  ;;  %v349_v20 = vcombine.low %v325_v17, %v331_v16  ;;  %v350_v21 = vcombine.high %v325_v17, %v331_v16 }
 0x18b   : > { %v357_v26 = vrot.slane %v349_v20, %v2158_v19  ;;  %v364_v27 = vrot.slane %v350_v21, %v2158_v19 }
 0x18c   : > { %v328_v22 = vpop.permute.xlu0 %327  ;;  %v479_v62 = vpop.permute.xlu1 %478 }
 0x18d   : > { %v333_v23 = vcombine.low %v317_v5, %v328_v22  ;;  %v334_v24 = vcombine.high %v317_v5, %v328_v22  ;;  %484 = vrot.lane.b32.xlu0 %v331_v16, %s1980_s27  ;;  %482 = vrot.lane.b32.xlu1 %v328_v22, %s1980_s27 }
 0x18f   : > { %v341_v28 = vrot.slane %v333_v23, %v2158_v19  ;;  %v348_v29 = vrot.slane %v334_v24, %v2158_v19 }
 0x191   : > { %v365_v30 = vcombine.low %v341_v28, %v357_v26  ;;  %v366_v31 = vcombine.high %v341_v28, %v357_v26  ;;  %v381_v32 = vcombine.low %v348_v29, %v364_v27  ;;  %v382_v33 = vcombine.high %v348_v29, %v364_v27  ;;  %636 = vrot.lane.b32.xlu0 %v325_v17, %s1984_s11 }
 0x192   : > { %634 = vrot.lane.b32.xlu1 %v317_v5, %s1984_s11 }
 0x193   : > { %v373_v34 = vrot.slane %v365_v30, %v2160_v25  ;;  %v380_v35 = vrot.slane %v366_v31, %v2160_v25  ;;  %v389_v36 = vrot.slane %v381_v32, %v2160_v25  ;;  %v396_v37 = vrot.slane %v382_v33, %v2160_v25 }
 0x195   : > { %v401_v38 = vcombine.low %v373_v34, %v380_v35  ;;  %v1563_v39 = vcombine.high %v373_v34, %v380_v35  ;;  %v417_v40 = vcombine.low %v389_v36, %v396_v37  ;;  %v1564_v41 = vcombine.high %v389_v36, %v396_v37  ;;  %640 = vrot.lane.b32.xlu0 %v331_v16, %s1984_s11 }
 0x196   : > { %638 = vrot.lane.b32.xlu1 %v328_v22, %s1984_s11 }
 0x197   : > { %v408_v42 = vrot.slane %v401_v38, %v2158_v19  ;;  %v416_v43 = vrot.slane %v1563_v39, %v2158_v19  ;;  %v424_v44 = vrot.slane %v417_v40, %v2158_v19  ;;  %v432_v45 = vrot.slane %v1564_v41, %v2158_v19 }
 0x199   : > { %v433_v46 = vcombine.low %v408_v42, %v416_v43  ;;  %v434_v47 = vcombine.high %v408_v42, %v416_v43  ;;  %v449_v48 = vcombine.low %v424_v44, %v432_v45  ;;  %v450_v49 = vcombine.high %v424_v44, %v432_v45 }
 0x19b   : > { %v441_v50 = vrot.slane %v433_v46, %v2160_v25  ;;  %v448_v51 = vrot.slane %v434_v47, %v2160_v25  ;;  %v457_v52 = vrot.slane %v449_v48, %v2160_v25  ;;  %v464_v53 = vrot.slane %v450_v49, %v2160_v25 }
 0x19d   : > { %v465_v54 = vcombine.low %v441_v50, %v457_v52  ;;  %v466_v55 = vcombine.high %v441_v50, %v457_v52  ;;  %v467_v56 = vcombine.low %v448_v51, %v464_v53  ;;  %v468_v57 = vcombine.high %v448_v51, %v464_v53 }
 0x19f   : > { %v469_v58 = vpack.c.bf16 %v465_v54, %v465_v54  ;;  %v470_v59 = vpack.c.bf16 %v466_v55, %v466_v55  ;;  %v471_v60 = vpack.c.bf16 %v467_v56, %v467_v56  ;;  %v472_v61 = vpack.c.bf16 %v468_v57, %v468_v57 }
 0x1a1   : > { %474 = vst.msk [vmem:[#allocation2] sm:$0xf] %vm473_vm2, %v469_v58  ;;  %475 = vst.msk [vmem:[#allocation2 + $0x4] sm:$0xf] %vm473_vm2, %v470_v59 }
 0x1a2   : > { %476 = vst.msk [vmem:[#allocation2 + $0x8] sm:$0xf] %vm473_vm2, %v471_v60  ;;  %477 = vst.msk [vmem:[#allocation2 + $0xc] sm:$0xf] %vm473_vm2, %v472_v61 }
 0x1fb   : > { %v481_v63 = vpop.permute.xlu0 %480 }
 0x1ff   : > { %v483_v1 = vpop.permute.xlu1 %482  ;;  %v485_v2 = vpop.permute.xlu0 %484 }
 0x200   : > { %v490_v3 = vcombine.low %v479_v62, %v483_v1  ;;  %v491_v4 = vcombine.high %v479_v62, %v483_v1  ;;  %v506_v5 = vcombine.low %v481_v63, %v485_v2  ;;  %v507_v6 = vcombine.high %v481_v63, %v485_v2 }
 0x202   : > { %v498_v7 = vrot.slane %v490_v3, %v2158_v19  ;;  %v505_v8 = vrot.slane %v491_v4, %v2158_v19  ;;  %v514_v9 = vrot.slane %v506_v5, %v2158_v19  ;;  %v521_v10 = vrot.slane %v507_v6, %v2158_v19 }
 0x203   : > { %v637_v11 = vpop.permute.xlu0 %636 }
 0x204   : > { %v522_v12 = vcombine.low %v498_v7, %v514_v9  ;;  %v523_v13 = vcombine.high %v498_v7, %v514_v9  ;;  %v538_v14 = vcombine.low %v505_v8, %v521_v10  ;;  %v539_v15 = vcombine.high %v505_v8, %v521_v10  ;;  %v635_v16 = vpop.permute.xlu1 %634 }
 0x206   : > { %v530_v17 = vrot.slane %v522_v12, %v2160_v25  ;;  %v537_v18 = vrot.slane %v523_v13, %v2160_v25  ;;  %v546_v20 = vrot.slane %v538_v14, %v2160_v25  ;;  %v553_v21 = vrot.slane %v539_v15, %v2160_v25 }
 0x207   : > { %v641_v22 = vpop.permute.xlu0 %640 }
 0x208   : > { %v558_v23 = vcombine.low %v530_v17, %v537_v18  ;;  %v1565_v24 = vcombine.high %v530_v17, %v537_v18  ;;  %v574_v26 = vcombine.low %v546_v20, %v553_v21  ;;  %v1566_v27 = vcombine.high %v546_v20, %v553_v21  ;;  %v639_v28 = vpop.permute.xlu1 %638 }
 0x209   : > { %v646_v29 = vcombine.low %v635_v16, %v639_v28  ;;  %v647_v30 = vcombine.high %v635_v16, %v639_v28  ;;  %v662_v31 = vcombine.low %v637_v11, %v641_v22  ;;  %v663_v32 = vcombine.high %v637_v11, %v641_v22 }
 0x20a   : > { %v565_v33 = vrot.slane %v558_v23, %v2158_v19  ;;  %v573_v34 = vrot.slane %v1565_v24, %v2158_v19  ;;  %v581_v35 = vrot.slane %v574_v26, %v2158_v19  ;;  %v589_v36 = vrot.slane %v1566_v27, %v2158_v19 }
 0x20b   : > { %v654_v37 = vrot.slane %v646_v29, %v2158_v19  ;;  %v661_v38 = vrot.slane %v647_v30, %v2158_v19  ;;  %v670_v39 = vrot.slane %v662_v31, %v2158_v19  ;;  %v677_v40 = vrot.slane %v663_v32, %v2158_v19  ;;  %v795_v32 = vld [vmem:[#allocation2] sm:$0xf] }
 0x20c   : > { %v590_v41 = vcombine.low %v565_v33, %v573_v34  ;;  %v591_v42 = vcombine.high %v565_v33, %v573_v34  ;;  %v606_v43 = vcombine.low %v581_v35, %v589_v36  ;;  %v607_v44 = vcombine.high %v581_v35, %v589_v36  ;;  %v796_v33 = vld [vmem:[#allocation2 + $0x4] sm:$0xf] }
 0x20d   : > { %v678_v45 = vcombine.low %v654_v37, %v670_v39  ;;  %v679_v46 = vcombine.high %v654_v37, %v670_v39  ;;  %v694_v47 = vcombine.low %v661_v38, %v677_v40  ;;  %v695_v48 = vcombine.high %v661_v38, %v677_v40  ;;  %v797_v38 = vld [vmem:[#allocation2 + $0x8] sm:$0xf]  ;;  %v798_v39 = vld [vmem:[#allocation2 + $0xc] sm:$0xf] }
 0x20e   : > { %v598_v49 = vrot.slane %v590_v41, %v2160_v25  ;;  %v605_v50 = vrot.slane %v591_v42, %v2160_v25  ;;  %v614_v51 = vrot.slane %v606_v43, %v2160_v25  ;;  %v621_v52 = vrot.slane %v607_v44, %v2160_v25 }
 0x20f   : > { %v686_v53 = vrot.slane %v678_v45, %v2160_v25  ;;  %v693_v54 = vrot.slane %v679_v46, %v2160_v25  ;;  %v702_v55 = vrot.slane %v694_v47, %v2160_v25  ;;  %v709_v56 = vrot.slane %v695_v48, %v2160_v25 }
 0x210   : > { %v622_v57 = vcombine.low %v598_v49, %v614_v51  ;;  %v623_v58 = vcombine.high %v598_v49, %v614_v51  ;;  %v624_v59 = vcombine.low %v605_v50, %v621_v52  ;;  %v625_v60 = vcombine.high %v605_v50, %v621_v52 }
 0x211   : > { %v714_v61 = vcombine.low %v686_v53, %v693_v54  ;;  %v1567_v62 = vcombine.high %v686_v53, %v693_v54  ;;  %v730_v63 = vcombine.low %v702_v55, %v709_v56  ;;  %v1568_v1 = vcombine.high %v702_v55, %v709_v56 }
 0x212   : > { %v626_v2 = vpack.c.bf16 %v622_v57, %v622_v57  ;;  %v627_v3 = vpack.c.bf16 %v623_v58, %v623_v58  ;;  %v628_v4 = vpack.c.bf16 %v624_v59, %v624_v59  ;;  %v629_v5 = vpack.c.bf16 %v625_v60, %v625_v60 }
 0x213   : > { %v721_v6 = vrot.slane %v714_v61, %v2158_v19  ;;  %v729_v7 = vrot.slane %v1567_v62, %v2158_v19  ;;  %v737_v8 = vrot.slane %v730_v63, %v2158_v19  ;;  %v745_v9 = vrot.slane %v1568_v1, %v2158_v19 }
 0x214   : > { %630 = vst.msk [vmem:[#allocation3] sm:$0xf] %vm473_vm2, %v626_v2  ;;  %631 = vst.msk [vmem:[#allocation3 + $0x4] sm:$0xf] %vm473_vm2, %v627_v3 }
 0x215   : > { %632 = vst.msk [vmem:[#allocation3 + $0x8] sm:$0xf] %vm473_vm2, %v628_v4  ;;  %633 = vst.msk [vmem:[#allocation3 + $0xc] sm:$0xf] %vm473_vm2, %v629_v5  ;;  %v746_v10 = vcombine.low %v721_v6, %v729_v7  ;;  %v747_v11 = vcombine.high %v721_v6, %v729_v7  ;;  %v762_v12 = vcombine.low %v737_v8, %v745_v9 }
 0x216   : > { %v763_v13 = vcombine.high %v737_v8, %v745_v9 }
 0x217   : > { %v754_v14 = vrot.slane %v746_v10, %v2160_v25  ;;  %v761_v15 = vrot.slane %v747_v11, %v2160_v25  ;;  %v770_v16 = vrot.slane %v762_v12, %v2160_v25 }
 0x218   : > { %v777_v19 = vrot.slane %v763_v13, %v2160_v25 }
 0x219   : > { %v778_v17 = vcombine.low %v754_v14, %v770_v16  ;;  %v779_v18 = vcombine.high %v754_v14, %v770_v16 }
 0x21a   : > { %v780_v20 = vcombine.low %v761_v15, %v777_v19  ;;  %v781_v21 = vcombine.high %v761_v15, %v777_v19 }
 0x21b   : > { %v782_v22 = vpack.c.bf16 %v778_v17, %v778_v17  ;;  %v783_v23 = vpack.c.bf16 %v779_v18, %v779_v18  ;;  %v799_v27 = vld [vmem:[#allocation3] sm:$0xf]  ;;  %v800_v28 = vld [vmem:[#allocation3 + $0x4] sm:$0xf] }
 0x21c   : > { %v784_v24 = vpack.c.bf16 %v780_v20, %v780_v20  ;;  %v785_v26 = vpack.c.bf16 %v781_v21, %v781_v21  ;;  %v812_v29 = vsel %vm807_vm3, %v799_v27, 0  ;;  %v858_v30 = vsel %vm807_vm3, %v800_v28, 0  ;;  %v801_v25 = vld [vmem:[#allocation3 + $0x8] sm:$0xf]  ;;  %v802_v31 = vld [vmem:[#allocation3 + $0xc] sm:$0xf] }
 0x21d   : > { %786 = vst.msk [vmem:[#allocation4] sm:$0xf] %vm473_vm2, %v782_v22  ;;  %787 = vst.msk [vmem:[#allocation4 + $0x4] sm:$0xf] %vm473_vm2, %v783_v23  ;;  %1622 = vmatpush3.bf16.xpose.msra.mxu1 %v812_v29  ;;  %1628 = vmatpush3.bf16.xpose.msra.mxu0 %v858_v30  ;;  %v904_v34 = vsel %vm807_vm3, %v801_v25, 0  ;;  %v950_v35 = vsel %vm807_vm3, %v802_v31, 0 }
 0x21e   : > { %788 = vst.msk [vmem:[#allocation4 + $0x8] sm:$0xf] %vm473_vm2, %v784_v24  ;;  %789 = vst.msk [vmem:[#allocation4 + $0xc] sm:$0xf] %vm473_vm2, %v785_v26  ;;  %1633 = vmatprep.subr.bf16.mxu1 %v1976_v0  ;;  %1639 = vmatprep.subr.bf16.mxu0 %v1976_v0  ;;  %v1229_v28 = vld [vmem:[#allocation10 + $0x4] sm:$0xf] }
 0x21f   : > { %v1234_v29 = vsel %vm1035_vm4, %v1229_v28, 0  ;;  %v1226_v30 = vld [vmem:[#allocation10] sm:$0xf] }
 0x220   : > { %v1280_v25 = vsel %vm1035_vm4, %v1226_v30, 0 }
 0x224   : > { %1624 = vmatmul.mubr.msk.bf16.vlgmr.msra.gmra.mxu1 %vm807_vm3, %v795_v32  ;;  %1630 = vmatmul.mubr.msk.bf16.vlgmr.msra.gmra.mxu0 %vm807_vm3, %v796_v33  ;;  %v803_v36 = vld [vmem:[#allocation4] sm:$0xf]  ;;  %v804_v37 = vld [vmem:[#allocation4 + $0x4] sm:$0xf] }
 0x225   : > { %1634 = vmatpush3.bf16.xpose.msra.mxu1 %v904_v34  ;;  %1640 = vmatpush3.bf16.xpose.msra.mxu0 %v950_v35  ;;  %v1037_v40 = vsel %vm1035_vm4, %v803_v36, 0  ;;  %v1083_v41 = vsel %vm1035_vm4, %v804_v37, 0  ;;  %v805_v12 = vld [vmem:[#allocation4 + $0x8] sm:$0xf]  ;;  %v806_v16 = vld [vmem:[#allocation4 + $0xc] sm:$0xf] }
 0x226   : > { %1635 = vmatprep.mubr.msk.bf16.mxu1 %vm1977_vm0, %v1976_v0  ;;  %1641 = vmatprep.mubr.msk.bf16.mxu0 %vm1977_vm0, %v1976_v0  ;;  %v1129_v18 = vsel %vm1035_vm4, %v805_v12, 0  ;;  %v1175_v20 = vsel %vm1035_vm4, %v806_v16, 0  ;;  %v1374_v37 = vld [vmem:[#allocation10 + $0xc] sm:$0xf] }
 0x227   : > { %1645 = vmatprep.subr.bf16.mxu1 %v1976_v0  ;;  %1651 = vmatprep.subr.bf16.mxu0 %v1976_v0 }
 0x22c   : > { %1636 = vmatmul.mubr.msk.bf16.vlgmr.msra.gmra.mxu1 %vm807_vm3, %v797_v38  ;;  %1642 = vmatmul.mubr.msk.bf16.vlgmr.msra.gmra.mxu0 %vm807_vm3, %v798_v39 }
 0x22d   : > { %1646 = vmatpush3.bf16.msra.mxu1 %v1037_v40  ;;  %1652 = vmatpush3.bf16.msra.mxu0 %v1083_v41  ;;  %v1324_v41 = vld [vmem:[#allocation10 + $0x8] sm:$0xf] }
 0x22e   : > { %1647 = vmatprep.mubr.msk.bf16.mxu1 %vm1977_vm0, %v1976_v0  ;;  %1653 = vmatprep.mubr.msk.bf16.mxu0 %vm1977_vm0, %v1976_v0 }
 0x22f   : > { %1657 = vmatprep.subr.bf16.mxu1 %v1976_v0  ;;  %1663 = vmatprep.subr.bf16.mxu0 %v1976_v0 }
 0x2e4   : > { %v848_v42 = vpop.f32.mrf.mxu1  ;;  %v894_v43 = vpop.f32.mrf.mxu0 }
 0x2e5   : > { %v992_v44 = vsel %vm807_vm3, %v848_v42, -inf  ;;  %v995_v45 = vsel %vm807_vm3, %v894_v43, -inf }
 0x2e6   : > { %993 = vmax.xlane.f32.xlu1 %v992_v44  ;;  %v1625_v46 = vpop.f32.mrf.mxu1  ;;  %996 = vmax.xlane.f32.xlu0 %v995_v45  ;;  %v1631_v47 = vpop.f32.mrf.mxu0 }
 0x2e7   : > { %v1379_v46 = vsel %vm1035_vm4, %v1374_v37, 0 }
 0x2e8   : > { %v851_v48 = vpop.f32.mrf.mxu1  ;;  %v897_v49 = vpop.f32.mrf.mxu0 }
 0x2e9   : > { %v1329_v49 = vsel %vm1035_vm4, %v1324_v41, 0 }
 0x2ea   : > { %v1626_v50 = vpop.f32.mrf.mxu1  ;;  %v1632_v51 = vpop.f32.mrf.mxu0 }
 0x2ec   : > { %v940_v52 = vpop.f32.mrf.mxu1  ;;  %v986_v53 = vpop.f32.mrf.mxu0 }
 0x2ed   : > { %v998_v54 = vsel %vm807_vm3, %v940_v52, -inf  ;;  %v1001_v55 = vsel %vm807_vm3, %v986_v53, -inf }
 0x2ee   : > { %v1637_v56 = vpop.f32.mrf.mxu1  ;;  %999 = vmax.xlane.f32.xlu0 %v998_v54  ;;  %1002 = vmax.xlane.f32.xlu1 %v1001_v55  ;;  %v1643_v57 = vpop.f32.mrf.mxu0 }
 0x2f0   : > { %v943_v58 = vpop.f32.mrf.mxu1  ;;  %v989_v59 = vpop.f32.mrf.mxu0 }
 0x2f2   : > { %v1638_v60 = vpop.f32.mrf.mxu1  ;;  %v1644_v61 = vpop.f32.mrf.mxu0 }
 0x36f   : > { %v994_v62 = vpop.xlane.xlu1 %993  ;;  %v997_v63 = vpop.xlane.xlu0 %996 }
 0x370   : > { %v1004_v1 = vsub.f32 %v848_v42, %v994_v62  ;;  %v1005_v2 = vsub.f32 %v894_v43, %v997_v63 }
 0x372   : > { %v1008_v3 = vmul.f32 1.442695, %v1004_v1  ;;  %v1010_v4 = vmul.f32 1.442695, %v1005_v2 }
 0x374   : > { %1789 = vpow2.f32 %v1008_v3 }
 0x375   : > { %1791 = vpow2.f32 %v1010_v4 }
 0x377   : > { %v1000_v5 = vpop.xlane.xlu0 %999  ;;  %v1003_v6 = vpop.xlane.xlu1 %1002 }
 0x378   : > { %v1006_v7 = vsub.f32 %v940_v52, %v1000_v5  ;;  %v1007_v8 = vsub.f32 %v986_v53, %v1003_v6 }
 0x37a   : > { %v1012_v9 = vmul.f32 1.442695, %v1006_v7  ;;  %v1014_v10 = vmul.f32 1.442695, %v1007_v8 }
 0x37c   : > { %1793 = vpow2.f32 %v1012_v9 }
 0x37d   : > { %1795 = vpow2.f32 %v1014_v10 }
 0x381   : > { %v1790_v11 = vpop.eup %1789 }
 0x382   : > { %v1792_v13 = vpop.eup %1791  ;;  %v1016_v14 = vsel %vm807_vm3, %v1790_v11, 0.0  ;;  %v1028_v15 = vpack.c.bf16 %v1790_v11, %v1790_v11 }
 0x383   : > { %v1019_v19 = vsel %vm807_vm3, %v1792_v13, 0.0  ;;  %1017 = vadd.xlane.f32.xlu1 %v1016_v14  ;;  %v1029_v17 = vpack.c.bf16 %v1792_v13, %v1792_v13 }
 0x384   : > { %1020 = vadd.xlane.f32.xlu0 %v1019_v19  ;;  %1648 = vmatmul.mubr.msk.bf16.vlgmr.msra.gmra.mxu1 %vm807_vm3, %v1028_v15  ;;  %v1581_v15 = vld [vmem:[%s2345_s3] ss:$0 sm:$0xff] }
 0x385   : > { %1654 = vmatmul.mubr.msk.bf16.vlgmr.msra.gmra.mxu0 %vm807_vm3, %v1029_v17  ;;  %1658 = vmatpush3.bf16.msra.mxu1 %v1129_v18 }
 0x386   : > { %1664 = vmatpush3.bf16.msra.mxu0 %v1175_v20  ;;  %1659 = vmatprep.mubr.msk.bf16.mxu1 %vm1977_vm0, %v1976_v0 }
 0x387   : > { %1665 = vmatprep.mubr.msk.bf16.mxu0 %vm1977_vm0, %v1976_v0  ;;  %1669 = vmatprep.subr.bf16.mxu1 %v1976_v0 }
 0x388   : > { %1675 = vmatprep.subr.bf16.mxu0 %v1976_v0 }
 0x389   : > { %v1794_v21 = vpop.eup %1793 }
 0x38a   : > { %v1796_v22 = vpop.eup %1795  ;;  %v1022_v23 = vsel %vm807_vm3, %v1794_v21, 0.0  ;;  %v1030_v24 = vpack.c.bf16 %v1794_v21, %v1794_v21 }
 0x38b   : > { %1023 = vadd.xlane.f32.xlu0 %v1022_v23  ;;  %v1025_v26 = vsel %vm807_vm3, %v1796_v22, 0.0  ;;  %v1031_v27 = vpack.c.bf16 %v1796_v22, %v1796_v22 }
 0x38c   : > { %1026 = vadd.xlane.f32.xlu1 %v1025_v26  ;;  %1660 = vmatmul.mubr.msk.bf16.vlgmr.msra.gmra.mxu1 %vm807_vm3, %v1030_v24 }
 0x38d   : > { %1666 = vmatmul.mubr.msk.bf16.vlgmr.msra.gmra.mxu0 %vm807_vm3, %v1031_v27  ;;  %1671 = vmatprep.mubr.msk.bf16.mxu1 %vm1977_vm0, %v1976_v0 }
 0x38e   : > { %1677 = vmatprep.mubr.msk.bf16.mxu0 %vm1977_vm0, %v1976_v0  ;;  %1670 = vmatpush3.bf16.msra.mxu1 %v1234_v29 }
 0x38f   : > { %1681 = vmatprep.subr.bf16.mxu1 %v1976_v0  ;;  %1676 = vmatpush3.bf16.msra.mxu0 %v1280_v25 }
 0x390   : > { %1687 = vmatprep.subr.bf16.mxu0 %v1976_v0 }
 0x40c   : > { %v1018_v31 = vpop.xlane.xlu1 %1017 }
 0x40d   : > { %v1021_v32 = vpop.xlane.xlu0 %1020  ;;  %1797 = vrcp.f32 %v1018_v31 }
 0x40e   : > { %1799 = vrcp.f32 %v1021_v32 }
 0x414   : > { %v1024_v33 = vpop.xlane.xlu0 %1023 }
 0x415   : > { %v1027_v34 = vpop.xlane.xlu1 %1026  ;;  %1801 = vrcp.f32 %v1024_v33 }
 0x416   : > { %1803 = vrcp.f32 %v1027_v34 }
 0x41a   : > { %v1798_v35 = vpop.eup %1797 }
 0x41b   : > { %v1800_v38 = vpop.eup %1799 }
 0x422   : > { %v1802_v53 = vpop.eup %1801 }
 0x423   : > { %v1804_v55 = vpop.eup %1803 }
 0x444   : > { %v1073_v36 = vpop.f32.mrf.mxu1 }
 0x445   : > { %v1221_v39 = vmul.f32 %v1798_v35, %v1073_v36  ;;  %v1119_v40 = vpop.f32.mrf.mxu0 }
 0x446   : > { %v1222_v42 = vmul.f32 %v1800_v38, %v1119_v40  ;;  %v1649_v43 = vpop.f32.mrf.mxu1 }
 0x447   : > { %v1225_v44 = vpack.c.bf16 %v1221_v39, %v1221_v39  ;;  %v1655_v45 = vpop.f32.mrf.mxu0 }
 0x448   : > { %v1227_v47 = vpack.c.bf16 %v1222_v42, %v1222_v42  ;;  %v1076_v48 = vpop.f32.mrf.mxu1 }
 0x449   : > { %v1122_v50 = vpop.f32.mrf.mxu0  ;;  %1678 = vmatmul.mubr.msk.bf16.vlgmr.msra.gmra.mxu0 %vm807_vm3, %v1225_v44 }
 0x44a   : > { %1672 = vmatmul.mubr.msk.bf16.vlgmr.msra.gmra.mxu1 %vm807_vm3, %v1227_v47  ;;  %v1650_v51 = vpop.f32.mrf.mxu1  ;;  %1688 = vmatpush3.bf16.msra.mxu0 %v1379_v46 }
 0x44b   : > { %v1656_v52 = vpop.f32.mrf.mxu0  ;;  %1682 = vmatpush3.bf16.msra.mxu1 %v1329_v49  ;;  %1683 = vmatprep.mubr.msk.bf16.mxu1 %vm1977_vm0, %v1976_v0 }
 0x44c   : > { %v1165_v54 = vpop.f32.mrf.mxu1  ;;  %1689 = vmatprep.mubr.msk.bf16.mxu0 %vm1977_vm0, %v1976_v0 }
 0x44d   : > { %v1223_v56 = vmul.f32 %v1802_v53, %v1165_v54  ;;  %v1211_v57 = vpop.f32.mrf.mxu0 }
 0x44e   : > { %v1224_v58 = vmul.f32 %v1804_v55, %v1211_v57  ;;  %v1661_v59 = vpop.f32.mrf.mxu1 }
 0x44f   : > { %v1322_v60 = vpack.c.bf16 %v1223_v56, %v1223_v56  ;;  %v1667_v61 = vpop.f32.mrf.mxu0 }
 0x450   : > { %v1372_v62 = vpack.c.bf16 %v1224_v58, %v1224_v58  ;;  %v1168_v63 = vpop.f32.mrf.mxu1 }
 0x451   : > { %v1214_v1 = vpop.f32.mrf.mxu0 }
 0x452   : > { %1684 = vmatmul.mubr.msk.bf16.vlgmr.msra.gmra.mxu1 %vm807_vm3, %v1322_v60  ;;  %1690 = vmatmul.mubr.msk.bf16.vlgmr.msra.gmra.mxu0 %vm807_vm3, %v1372_v62  ;;  %v1662_v2 = vpop.f32.mrf.mxu1 }
 0x453   : > { %v1668_v3 = vpop.f32.mrf.mxu0 }
 0x509   : > { %v1316_v4 = vpop.f32.mrf.mxu0 }
 0x50a   : > { %v1270_v0 = vpop.f32.mrf.mxu1 }
 0x50b   : > { %v1679_v5 = vpop.f32.mrf.mxu0  ;;  %v1317_v11 = vadd.f32 %v1316_v4, %v1270_v0 }
 0x50c   : > { %v1673_v6 = vpop.f32.mrf.mxu1 }
 0x50d   : > { %v1319_v7 = vpop.f32.mrf.mxu0 }
 0x50e   : > { %v1273_v8 = vpop.f32.mrf.mxu1 }
 0x50f   : > { %v1680_v9 = vpop.f32.mrf.mxu0 }
 0x510   : > { %v1674_v10 = vpop.f32.mrf.mxu1 }
 0x512   : > { %v1365_v12 = vpop.f32.mrf.mxu1  ;;  %v1415_v13 = vpop.f32.mrf.mxu0 }
 0x513   : > { %v1371_v14 = vadd.f32 %v1365_v12, %v1317_v11 }
 0x514   : > { %v1685_v16 = vpop.f32.mrf.mxu1  ;;  %v1691_v19 = vpop.f32.mrf.mxu0 }
 0x515   : > { %v1421_v17 = vadd.f32 %v1415_v13, %v1371_v14 }
 0x516   : > { %v1368_v18 = vpop.f32.mrf.mxu1  ;;  %v1418_v20 = vpop.f32.mrf.mxu0 }
 0x517   : > { %v1429_v21 = vadd.f32 %v1581_v15, %v1421_v17 }
 0x518   : > { %v1686_v22 = vpop.f32.mrf.mxu1  ;;  %v1692_v23 = vpop.f32.mrf.mxu0 }
 0x519   : > { %1431 = vst.msk [vmem:[%s255_s14] sm:$0xff] %vm279_vm1, %v1429_v21 }
 0x51a   : > { %1898 = shalt.err (!%p1895_p5)
}
 0x51b   : > { %s1899_s27 = scalar_lea.hbm %s2293_s8, 128  ;;  %s1903_s11 = scalar_lea.hbm %s2346_s4, 256 }
 0x51c   : > { %p1900_p10 = scmp.ne.s32.totalorder %s2293_s8, %s1899_s27  ;;  %p1904_p6 = scmp.lt.s32.totalorder %s2293_s8, %s2346_s4 }
 0x51d   : > { %p1905_p12 = scmp.lt.s32.totalorder %s1903_s11, %s1899_s27 }
 0x51e   : > { %p1901_p1 = pnand %p1900_p10, %p2106_p7 }
 0x51f   : > { %p1906_p3 = por %p1905_p12, %p1904_p6 }
 0x520   : > { %p1902_p4 = pneg %p1901_p1 }
 0x522   : > { %p1907_p8 = pnand %p1906_p3, %p1902_p4 }
 0x524   : > { %1910 = shalt.err (!%p1907_p8)
}
 0x525   : > { %1703 = dma.vmem_to_hbm [thread:$0]  (%p2106_p7), %s2295_s22, 128, %s2293_s8, %s1433_s18  }
 0x526 PF: > { %s1459_s13 = sand.u32 1, %s1949_s15   ;;  %p2360_p9 = scmp.ne.s32.totalorder %s2353_s26, 0 }
 0x527   : > { %p2361_p11 = scmp.ge.s32.totalorder %s1969_s20, 2  ;;  %s1460_s14 = scalar_lea.sflag [#allocation7], %s1459_s13 }
 0x529   : > { %p1717_p2 = pnand %p2361_p11, %p2360_p9 }
 0x52b   : > { %p1718_p13 = pneg %p1717_p2 }
 0x52d   : > { %1944 = dma.done.wait (%p1718_p13), %s1460_s14, 128  }
 0x52e   : > { %1946 = vsyncadd (%p1718_p13), %s1460_s14, 4294967168  ;;  %s21_s20 = sadd.s32 1, %s1969_s20   ;;  %s2362_s15 = smov %s1953_s16 }
 0x52f   : > { %p18_p0 = scmp.ge.s32.totalorder %s21_s20, 4   ;;  %s2363_s16 = smov %s1957_s17 }
 0x530   : > { %s2364_s17 = smov %s2115_s7  ;;  %s2365_s18 = smov %s1965_s19 }
 0x531   : > { %s2366_s19 = smov %s2368_s21  ;;  %20 = sbr.rel (!%p18_p0) target bundleno = 7 (0x7), region = 97 }
 0x536   :  { %1465 = vsyncpa [#allocation6], 1 }
 0x537   :  { %1467 = vsyncpa [#allocation6 + $0x1], 1 }
 0x538   :  { %1468 = vsyncpa [#allocation9], 1 }
 0x539   :  { %1469 = vsyncpa [#allocation7], 1 }
 0x53a   :  { %1471 = vsyncpa [#allocation7 + $0x1], 1 }

</bundles_post_ra>
